<compile_context>
chip_gen: v7x
topology: tpu7x:2x2x1
jax: 0.10.0
libtpu: 0.0.40
codegen_flags: <defaults>
</compile_context>

<pallas_src>
import jax
import jax.numpy as jnp
from jax.experimental import pallas as pl
from jax.experimental.pallas import tpu as pltpu


# ------------------------------- Pallas kernel -------------------------------


def _cse_kernel(x_ref, w1_ref, b1_ref, w2_ref, b2_ref, o_ref, s_ref, g_ref):
    """Fused cSE block for a block of TN images.

    x_ref:  (TN, C, HW)  activations, channels on sublanes, spatial on lanes
    w1_ref: (Cr, C)      Linear(C -> Cr) weight, PyTorch (out, in) layout
    b1_ref: (Cr, 1)
    w2_ref: (C, Cr)      Linear(Cr -> C) weight, PyTorch (out, in) layout
    b2_ref: (C, 1)
    o_ref:  (TN, C, HW)
    s_ref:  (C, TN)      scratch: pooled features, batch on lanes
    g_ref:  (C, TN)      scratch: sigmoid gate, batch on lanes
    """
    tn, _, hw = x_ref.shape
    inv_hw = 1.0 / hw

    # 1) Global average pool, assembled batch-on-lanes into s_ref:(C, TN).
    #    Per-image lane reduce (XLU) + single-lane scratch store avoids any
    #    transpose/relayout.  Static unroll; iterations are independent.
    for n in range(tn):
        col = jnp.sum(x_ref[n].astype(jnp.float32), axis=1, keepdims=True) * inv_hw
        s_ref[:, n : n + 1] = col                                   # (C, 1) -> lane n

    # 2) FC1 + ReLU and FC2 + Sigmoid as batched matmuls (TN-lane-wide MXU output).
    s = s_ref[...]                                                  # (C, TN)
    h = jnp.dot(w1_ref[...], s, preferred_element_type=jnp.float32) + b1_ref[...]
    h = jnp.maximum(h, 0.0)                                         # (Cr, TN)
    z = jnp.dot(w2_ref[...], h, preferred_element_type=jnp.float32) + b2_ref[...]
    g_ref[...] = 1.0 / (1.0 + jnp.exp(-z))                          # (C, TN); exp -> EUP

    # 3) Channel re-scale.  x is re-read per image (not kept live across the FCs);
    #    (C,1) gate column broadcasts over (C, HW); HW is a multiple of 128 so the
    #    store is unmasked and lane-dense.
    for n in range(tn):
        a_col = g_ref[:, n : n + 1]                                 # (C, 1)
        o_ref[n] = (x_ref[n].astype(jnp.float32) * a_col).astype(o_ref.dtype)


# -------------------------------- op wrapper ---------------------------------


def cse_block(x_nchw, w1, b1, w2, b2, *, tn=None):
    """cSEBlock forward.

    x: (N, C, H, W) f32 or bf16; w1: (C//r, C); b1: (C//r,); w2: (C, C//r); b2: (C,).
    """
    N, C, H, W = x_nchw.shape
    Cr = w1.shape[0]
    HW = H * W
    itemsize = jnp.dtype(x_nchw.dtype).itemsize

    # ---- choose images per grid step (TN) ----
    if tn is None:
        # ~1 MiB of activation per step: with in+out double-buffering that's ~4 MiB
        # of VMEM, comfortably inside every generation's scoped limit.
        cap = max(1, min(64, (1 << 20) // max(1, C * HW * itemsize)))
        if N <= cap:
            tn = N                      # whole batch in a single grid step
        else:
            steps = -(-N // cap)
            # v7x: even number of steps and >=4, so each TensorCore gets >=2 steps
            # and can overlap DMA of step i+1 with compute of step i.
            steps = max(4, steps + (steps & 1))
            tn = -(-N // steps)
    tn = max(1, min(int(tn), N))

    # ---- zero-pad the tail block (padded rows produce zero outputs, sliced off) ----
    n_pad = (-N) % tn
    x3 = x_nchw.reshape(N, C, HW)       # free reshape: keeps contiguous NCHW order
    if n_pad:
        x3 = jnp.concatenate([x3, jnp.zeros((n_pad, C, HW), x3.dtype)], axis=0)
    Np = N + n_pad
    grid = (Np // tn,)

    w1f = w1.astype(jnp.float32)
    w2f = w2.astype(jnp.float32)
    b1c = b1.reshape(Cr, 1).astype(jnp.float32)
    b2c = b2.reshape(C, 1).astype(jnp.float32)

    tile_bytes = tn * C * HW * itemsize
    param_bytes = 4 * (w1f.size + w2f.size + b1c.size + b2c.size)
    # in + out tiles double-buffered + resident params + slack; clamp to a safe range.
    vmem_limit = int(min(32 << 20, max(16 << 20, 4 * tile_bytes + 2 * param_bytes + (2 << 20))))

    cost = pl.CostEstimate(
        flops=4 * N * C * Cr + 2 * N * C * HW,
        transcendentals=N * C,
        bytes_accessed=2 * N * C * HW * itemsize + param_bytes,
    )

    out = pl.pallas_call(
        _cse_kernel,
        out_shape=jax.ShapeDtypeStruct((Np, C, HW), x_nchw.dtype),
        grid=grid,
        in_specs=[
            pl.BlockSpec((tn, C, HW), lambda n: (n, 0, 0)),   # batched activation block
            pl.BlockSpec((Cr, C), lambda n: (0, 0)),          # weights/biases stay resident
            pl.BlockSpec((Cr, 1), lambda n: (0, 0)),
            pl.BlockSpec((C, Cr), lambda n: (0, 0)),
            pl.BlockSpec((C, 1), lambda n: (0, 0)),
        ],
        out_specs=pl.BlockSpec((tn, C, HW), lambda n: (n, 0, 0)),
        scratch_shapes=[
            pltpu.VMEM((C, tn), jnp.float32),                 # pooled features (C, TN)
            pltpu.VMEM((C, tn), jnp.float32),                 # sigmoid gate   (C, TN)
        ],
        compiler_params=pltpu.CompilerParams(
            dimension_semantics=("parallel",),                # no-op on v5e/v6e; v7x megacore
            vmem_limit_bytes=vmem_limit,
        ),
        cost_estimate=cost,
    )(x3, w1f, b1c, w2f, b2c)

    if n_pad:
        out = out[:N]
    return out.reshape(N, C, H, W)


# ------------------------------ reference (jnp) -------------------------------


def _ref_forward(x, w1, b1, w2, b2):
    s = jnp.mean(x, axis=(2, 3))                              # (N, C)
    h = jnp.maximum(s @ w1.T + b1, 0.0)                       # (N, Cr)
    a = jax.nn.sigmoid(h @ w2.T + b2)                         # (N, C)
    return a[:, :, None, None] * x


# ----------------------------------- main -------------------------------------

if __name__ == "__main__":
    key = jax.random.PRNGKey(0)
    kx, k1, k2, k3, k4, kx2 = jax.random.split(key, 6)

    N, C, H, W, r = 2, 32, 16, 16, 4
    Cr = C // r

    x = jax.random.normal(kx, (N, C, H, W), jnp.float32)
    w1 = 0.2 * jax.random.normal(k1, (Cr, C), jnp.float32)    # PyTorch Linear: (out, in)
    b1 = 0.1 * jax.random.normal(k2, (Cr,), jnp.float32)
    w2 = 0.2 * jax.random.normal(k3, (C, Cr), jnp.float32)
    b2 = 0.1 * jax.random.normal(k4, (C,), jnp.float32)

    # --- f32 path (single grid step over the whole batch) ---
    fwd = jax.jit(cse_block)
    out = jax.block_until_ready(fwd(x, w1, b1, w2, b2))
    ref = _ref_forward(x, w1, b1, w2, b2)
    assert out.shape == (N, C, H, W), out.shape
    assert jnp.allclose(out, ref, rtol=1e-5, atol=1e-5), float(jnp.max(jnp.abs(out - ref)))

    # --- bf16 I/O path (halved HBM traffic; compute stays f32 inside the kernel) ---
    x_bf16 = x.astype(jnp.bfloat16)
    out_bf16 = jax.block_until_ready(jax.jit(cse_block)(x_bf16, w1, b1, w2, b2))
    ref_bf16 = _ref_forward(x_bf16.astype(jnp.float32), w1, b1, w2, b2)
    assert out_bf16.dtype == jnp.bfloat16
    assert jnp.allclose(out_bf16.astype(jnp.float32), ref_bf16, rtol=2e-2, atol=1e-2)

    # --- ragged batch: N=5 with TN=2 exercises the zero-padded tail block ---
    x5 = jax.random.normal(kx2, (5, C, H, W), jnp.float32)
    out5 = jax.block_until_ready(jax.jit(lambda a: cse_block(a, w1, b1, w2, b2, tn=2))(x5))
    ref5 = _ref_forward(x5, w1, b1, w2, b2)
    assert out5.shape == (5, C, H, W)
    assert jnp.allclose(out5, ref5, rtol=1e-5, atol=1e-5), float(jnp.max(jnp.abs(out5 - ref5)))

    print("KERNEL_OK")
</pallas_src>

<mosaic_0001>
module attributes {stable_mosaic.version = 11 : i64} {
  func.func @_cse_kernel(%arg0: i32, %arg1: memref<2x32x256xf32, #tpu.memory_space<vmem>>, %arg2: memref<8x32xf32, #tpu.memory_space<vmem>>, %arg3: memref<8x1xf32, #tpu.memory_space<vmem>>, %arg4: memref<32x8xf32, #tpu.memory_space<vmem>>, %arg5: memref<32x1xf32, #tpu.memory_space<vmem>>, %arg6: memref<2x32x256xf32, #tpu.memory_space<vmem>>, %arg7: memref<32x2xf32, #tpu.memory_space<vmem>>, %arg8: memref<32x2xf32, #tpu.memory_space<vmem>>) attributes {dimension_semantics = [#tpu.dimension_semantics<parallel>], iteration_bounds = array<i64: 1>, scalar_prefetch = 0 : i64, scratch_operands = 2 : i64, tpu.core_type = #tpu.core_type<tc>, window_params = [{transform_indices = @transform_0, window_bounds = array<i64: 2, 32, 256>}, {pipeline_mode = #tpu.pipeline_mode<synchronous>, transform_indices = @transform_1, window_bounds = array<i64: 8, 32>}, {pipeline_mode = #tpu.pipeline_mode<synchronous>, transform_indices = @transform_2, window_bounds = array<i64: 8, 1>}, {pipeline_mode = #tpu.pipeline_mode<synchronous>, transform_indices = @transform_3, window_bounds = array<i64: 32, 8>}, {pipeline_mode = #tpu.pipeline_mode<synchronous>, transform_indices = @transform_4, window_bounds = array<i64: 32, 1>}, {transform_indices = @transform_5, window_bounds = array<i64: 2, 32, 256>}]} {
    %c0 = arith.constant 0 : index
    %c0_0 = arith.constant 0 : index
    %c0_1 = arith.constant 0 : index
    %0 = vector.load %arg1[%c0, %c0_0, %c0_1] : memref<2x32x256xf32, #tpu.memory_space<vmem>>, vector<1x32x256xf32>
    %1 = vector.shape_cast %0 : vector<1x32x256xf32> to vector<32x256xf32>
    %cst = arith.constant dense<0.000000e+00> : vector<32xf32>
    %2 = vector.multi_reduction <add>, %1, %cst [1] : vector<32x256xf32> to vector<32xf32>
    %3 = vector.shape_cast %2 : vector<32xf32> to vector<32x1xf32>
    %cst_2 = arith.constant 3.906250e-03 : f32
    %4 = vector.broadcast %cst_2 : f32 to vector<32x1xf32>
    %5 = arith.mulf %3, %4 : vector<32x1xf32>
    %c0_3 = arith.constant 0 : index
    %c0_4 = arith.constant 0 : index
    %6 = vector.load %arg7[%c0_3, %c0_4] : memref<32x2xf32, #tpu.memory_space<vmem>>, vector<32x1xf32>
    tpu.vector_store %arg7[%c0_3, %c0_4], %5 {strides = array<i32>} : memref<32x2xf32, #tpu.memory_space<vmem>>, vector<32x1xf32>,
    %c1 = arith.constant 1 : index
    %c0_5 = arith.constant 0 : index
    %c0_6 = arith.constant 0 : index
    %7 = vector.load %arg1[%c1, %c0_5, %c0_6] : memref<2x32x256xf32, #tpu.memory_space<vmem>>, vector<1x32x256xf32>
    %8 = vector.shape_cast %7 : vector<1x32x256xf32> to vector<32x256xf32>
    %cst_7 = arith.constant dense<0.000000e+00> : vector<32xf32>
    %9 = vector.multi_reduction <add>, %8, %cst_7 [1] : vector<32x256xf32> to vector<32xf32>
    %10 = vector.shape_cast %9 : vector<32xf32> to vector<32x1xf32>
    %cst_8 = arith.constant 3.906250e-03 : f32
    %11 = vector.broadcast %cst_8 : f32 to vector<32x1xf32>
    %12 = arith.mulf %10, %11 : vector<32x1xf32>
    %c0_9 = arith.constant 0 : index
    %c1_10 = arith.constant 1 : index
    %13 = vector.load %arg7[%c0_9, %c1_10] : memref<32x2xf32, #tpu.memory_space<vmem>>, vector<32x1xf32>
    tpu.vector_store %arg7[%c0_9, %c1_10], %12 {strides = array<i32>} : memref<32x2xf32, #tpu.memory_space<vmem>>, vector<32x1xf32>,
    %c0_11 = arith.constant 0 : index
    %c0_12 = arith.constant 0 : index
    %14 = vector.load %arg7[%c0_11, %c0_12] : memref<32x2xf32, #tpu.memory_space<vmem>>, vector<32x2xf32>
    %c0_13 = arith.constant 0 : index
    %c0_14 = arith.constant 0 : index
    %15 = vector.load %arg2[%c0_13, %c0_14] : memref<8x32xf32, #tpu.memory_space<vmem>>, vector<8x32xf32>
    %cst_15 = arith.constant dense<0.000000e+00> : vector<8x2xf32>
    %16 = tpu.matmul %15, %14, %cst_15 {dimension_numbers = #tpu.dot_dimension_numbers<[1], [0], [0], [1], [0, 0, 1, 1], [], []>} : vector<8x32xf32>, vector<32x2xf32>, vector<8x2xf32> -> vector<8x2xf32>
    %c0_16 = arith.constant 0 : index
    %c0_17 = arith.constant 0 : index
    %17 = vector.load %arg3[%c0_16, %c0_17] : memref<8x1xf32, #tpu.memory_space<vmem>>, vector<8x1xf32>
    %18 = vector.broadcast %17 : vector<8x1xf32> to vector<8x2xf32>
    %19 = arith.addf %16, %18 : vector<8x2xf32>
    %cst_18 = arith.constant 0.000000e+00 : f32
    %20 = vector.broadcast %cst_18 : f32 to vector<8x2xf32>
    %21 = arith.maximumf %19, %20 : vector<8x2xf32>
    %c0_19 = arith.constant 0 : index
    %c0_20 = arith.constant 0 : index
    %22 = vector.load %arg4[%c0_19, %c0_20] : memref<32x8xf32, #tpu.memory_space<vmem>>, vector<32x8xf32>
    %cst_21 = arith.constant dense<0.000000e+00> : vector<32x2xf32>
    %23 = tpu.matmul %22, %21, %cst_21 {dimension_numbers = #tpu.dot_dimension_numbers<[1], [0], [0], [1], [0, 0, 1, 1], [], []>} : vector<32x8xf32>, vector<8x2xf32>, vector<32x2xf32> -> vector<32x2xf32>
    %c0_22 = arith.constant 0 : index
    %c0_23 = arith.constant 0 : index
    %24 = vector.load %arg5[%c0_22, %c0_23] : memref<32x1xf32, #tpu.memory_space<vmem>>, vector<32x1xf32>
    %25 = vector.broadcast %24 : vector<32x1xf32> to vector<32x2xf32>
    %26 = arith.addf %23, %25 : vector<32x2xf32>
    %cst_24 = arith.constant 0.000000e+00 : f32
    %27 = vector.broadcast %cst_24 : f32 to vector<32x2xf32>
    %28 = arith.subf %27, %26 : vector<32x2xf32>
    %29 = math.exp %28 : vector<32x2xf32>
    %cst_25 = arith.constant 1.000000e+00 : f32
    %30 = vector.broadcast %cst_25 : f32 to vector<32x2xf32>
    %31 = arith.addf %30, %29 : vector<32x2xf32>
    %cst_26 = arith.constant 1.000000e+00 : f32
    %32 = vector.broadcast %cst_26 : f32 to vector<32x2xf32>
    %33 = arith.divf %32, %31 : vector<32x2xf32>
    %c0_27 = arith.constant 0 : index
    %c0_28 = arith.constant 0 : index
    %34 = vector.load %arg8[%c0_27, %c0_28] : memref<32x2xf32, #tpu.memory_space<vmem>>, vector<32x2xf32>
    tpu.vector_store %arg8[%c0_27, %c0_28], %33 {strides = array<i32>} : memref<32x2xf32, #tpu.memory_space<vmem>>, vector<32x2xf32>,
    %c0_29 = arith.constant 0 : index
    %c0_30 = arith.constant 0 : index
    %35 = vector.load %arg8[%c0_29, %c0_30] : memref<32x2xf32, #tpu.memory_space<vmem>>, vector<32x1xf32>
    %c0_31 = arith.constant 0 : index
    %c0_32 = arith.constant 0 : index
    %c0_33 = arith.constant 0 : index
    %36 = vector.load %arg1[%c0_31, %c0_32, %c0_33] : memref<2x32x256xf32, #tpu.memory_space<vmem>>, vector<1x32x256xf32>
    %37 = vector.shape_cast %36 : vector<1x32x256xf32> to vector<32x256xf32>
    %38 = vector.broadcast %35 : vector<32x1xf32> to vector<32x256xf32>
    %39 = arith.mulf %37, %38 : vector<32x256xf32>
    %c0_34 = arith.constant 0 : index
    %c0_35 = arith.constant 0 : index
    %c0_36 = arith.constant 0 : index
    %40 = vector.load %arg6[%c0_34, %c0_35, %c0_36] : memref<2x32x256xf32, #tpu.memory_space<vmem>>, vector<1x32x256xf32>
    %41 = vector.shape_cast %40 : vector<1x32x256xf32> to vector<32x256xf32>
    %42 = vector.shape_cast %39 : vector<32x256xf32> to vector<1x32x256xf32>
    tpu.vector_store %arg6[%c0_34, %c0_35, %c0_36], %42 {strides = array<i32>} : memref<2x32x256xf32, #tpu.memory_space<vmem>>, vector<1x32x256xf32>,
    %c0_37 = arith.constant 0 : index
    %c1_38 = arith.constant 1 : index
    %43 = vector.load %arg8[%c0_37, %c1_38] : memref<32x2xf32, #tpu.memory_space<vmem>>, vector<32x1xf32>
    %c1_39 = arith.constant 1 : index
    %c0_40 = arith.constant 0 : index
    %c0_41 = arith.constant 0 : index
    %44 = vector.load %arg1[%c1_39, %c0_40, %c0_41] : memref<2x32x256xf32, #tpu.memory_space<vmem>>, vector<1x32x256xf32>
    %45 = vector.shape_cast %44 : vector<1x32x256xf32> to vector<32x256xf32>
    %46 = vector.broadcast %43 : vector<32x1xf32> to vector<32x256xf32>
    %47 = arith.mulf %45, %46 : vector<32x256xf32>
    %c1_42 = arith.constant 1 : index
    %c0_43 = arith.constant 0 : index
    %c0_44 = arith.constant 0 : index
    %48 = vector.load %arg6[%c1_42, %c0_43, %c0_44] : memref<2x32x256xf32, #tpu.memory_space<vmem>>, vector<1x32x256xf32>
    %49 = vector.shape_cast %48 : vector<1x32x256xf32> to vector<32x256xf32>
    %50 = vector.shape_cast %47 : vector<32x256xf32> to vector<1x32x256xf32>
    tpu.vector_store %arg6[%c1_42, %c0_43, %c0_44], %50 {strides = array<i32>} : memref<2x32x256xf32, #tpu.memory_space<vmem>>, vector<1x32x256xf32>,
    return
  }
  func.func @transform_0(%arg0: i32) -> (i32, i32, i32) {
    %c0_i32 = arith.constant 0 : i32
    %c0_i32_0 = arith.constant 0 : i32
    %c0_i32_1 = arith.constant 0 : i32
    return %arg0, %c0_i32, %c0_i32_0 : i32, i32, i32
  }
  func.func @transform_1(%arg0: i32) -> (i32, i32) {
    %c0_i32 = arith.constant 0 : i32
    %c0_i32_0 = arith.constant 0 : i32
    %c0_i32_1 = arith.constant 0 : i32
    return %c0_i32, %c0_i32_0 : i32, i32
  }
  func.func @transform_2(%arg0: i32) -> (i32, i32) {
    %c0_i32 = arith.constant 0 : i32
    %c0_i32_0 = arith.constant 0 : i32
    %c0_i32_1 = arith.constant 0 : i32
    return %c0_i32, %c0_i32_0 : i32, i32
  }
  func.func @transform_3(%arg0: i32) -> (i32, i32) {
    %c0_i32 = arith.constant 0 : i32
    %c0_i32_0 = arith.constant 0 : i32
    %c0_i32_1 = arith.constant 0 : i32
    return %c0_i32, %c0_i32_0 : i32, i32
  }
  func.func @transform_4(%arg0: i32) -> (i32, i32) {
    %c0_i32 = arith.constant 0 : i32
    %c0_i32_0 = arith.constant 0 : i32
    %c0_i32_1 = arith.constant 0 : i32
    return %c0_i32, %c0_i32_0 : i32, i32
  }
  func.func @transform_5(%arg0: i32) -> (i32, i32, i32) {
    %c0_i32 = arith.constant 0 : i32
    %c0_i32_0 = arith.constant 0 : i32
    %c0_i32_1 = arith.constant 0 : i32
    return %arg0, %c0_i32, %c0_i32_0 : i32, i32, i32
  }
}

</mosaic_0001>

<bundles_post_ra>
// kernel: cse_block.1
= control target key start
LH: loop header
LB: loop body
LE: loop exit
PB: predicated region body
PF: predicated region fallthrough
CT: control target
= control target key end

     0   :  { %v512_v24 = vmov 0.0|0.0   ;;  %vm513_vm0 = vmmov 0   ;;  %v514_v25 = vmov 0.0   ;;  %v515_v26 = vmov 0   ;;  %s752_s0 = inlined_call_operand.vmem [shape: f32[2,32,256], index: 0, kind: input, shape index: {}]   ;;  %s753_s2 = inlined_call_operand.vmem [shape: f32[8,1], index: 2, kind: input, shape index: {}]   ;;  %s754_s1 = inlined_call_operand.vmem [shape: f32[8,32], index: 1, kind: input, shape index: {}]   ;;  %s755_s3 = inlined_call_operand.vmem [shape: f32[32,8], index: 3, kind: input, shape index: {}]   ;;  %s756_s4 = inlined_call_operand.vmem [shape: f32[32,1], index: 4, kind: input, shape index: {}]   ;;  %s757_s5 = inlined_call_operand.vmem [shape: f32[2,32,256], index: 5, kind: output, shape index: {}]  }
   0x1   :  { %v550_v0 = vld [vmem:[%s752_s0 + $0x40] sm:$0xff]  ;;  %v555_v1 = vld [vmem:[%s752_s0 + $0x48] sm:$0xff]  ;;  %v572_v5 = vld [vmem:[%s752_s0 + $0x50] sm:$0xff]  ;;  %479 = vmatprep.subr.bf16.mxu0 %v512_v24  ;;  %468 = vmatprep.mubr.msk.f32.mxu0 %vm513_vm0, %v514_v25  ;;  %vm44_vm1 = vcmask 7168   ;;  %vm74_vm2 = vcmask 15368   ;;  %vm90_vm3 = vcmask 261120  }
   0x2   :  { %v560_v2 = vld [vmem:[%s752_s0] sm:$0xff]  ;;  %v58_v3 = vadd.f32 %v555_v1, %v550_v0  ;;  %v567_v4 = vld [vmem:[%s752_s0 + $0x8] sm:$0xff]  ;;  %v577_v6 = vld [vmem:[%s752_s0 + $0x58] sm:$0xff]  ;;  %490 = vset.pattern.permute.xlu0 %v515_v26  ;;  %491 = vset.pattern.permute.xlu1 %v515_v26  ;;  %vm193_vm4 = vcmask 64512   ;;  %vm315_vm5 = vcmask 15360  }
   0x3   :  { %v28_v7 = vadd.f32 %v567_v4, %v560_v2  ;;  %v584_v8 = vld [vmem:[%s752_s0 + $0x10] sm:$0xff]  ;;  %v589_v9 = vld [vmem:[%s752_s0 + $0x18] sm:$0xff]  ;;  %v61_v10 = vadd.f32 %v577_v6, %v572_v5  ;;  %v608_v14 = vld [vmem:[%s752_s0 + $0x20] sm:$0xff] }
   0x4   :  { %59 = vadd.xlane.f32.xlu1 %v58_v3  ;;  %v31_v11 = vadd.f32 %v589_v9, %v584_v8  ;;  %v598_v12 = vld [vmem:[%s752_s0 + $0x30] sm:$0xff]  ;;  %v603_v13 = vld [vmem:[%s752_s0 + $0x38] sm:$0xff]  ;;  %v613_v15 = vld [vmem:[%s752_s0 + $0x28] sm:$0xff]  ;;  %v516_v3 = vmov 1  }
   0x5   :  { %29 = vadd.xlane.f32.xlu0 %v28_v7  ;;  %v37_v16 = vadd.f32 %v603_v13, %v598_v12  ;;  %v34_v17 = vadd.f32 %v613_v15, %v608_v14  ;;  %v622_v18 = vld [vmem:[%s752_s0 + $0x70] sm:$0xff]  ;;  %v627_v19 = vld [vmem:[%s752_s0 + $0x78] sm:$0xff]  ;;  %v632_v20 = vld [vmem:[%s752_s0 + $0x60] sm:$0xff] }
   0x6   :  { %v637_v21 = vld [vmem:[%s752_s0 + $0x68] sm:$0xff]  ;;  %v67_v22 = vadd.f32 %v627_v19, %v622_v18  ;;  %v84_v27 = vld [vmem:[%s753_s2] sm:$0xff]  ;;  %v171_v54 = vld [vmem:[%s756_s4 + $0x10] sm:$0xff] }
   0x7   :  { %v64_v23 = vadd.f32 %v637_v21, %v632_v20  ;;  %v83_v50 = vld [vmem:[%s754_s1] sm:$0xff]  ;;  %v170_v53 = vld [vmem:[%s756_s4 + $0x8] sm:$0xff]  ;;  %v172_v55 = vld [vmem:[%s756_s4 + $0x18] sm:$0xff] }
   0x8   :  { %62 = vadd.xlane.f32.xlu1 %v61_v10  ;;  %v165_v51 = vld [vmem:[%s755_s3] sm:$0xff]  ;;  %v166_v61 = vld [vmem:[%s755_s3 + $0x8] sm:$0xff]  ;;  %v167_v62 = vld [vmem:[%s755_s3 + $0x10] sm:$0xff] }
   0x9   :  { %32 = vadd.xlane.f32.xlu0 %v31_v11  ;;  %473 = vmatprep.mubr.msk.f32.mxu1 %vm193_vm4, %v165_v51  ;;  %v169_v52 = vld [vmem:[%s756_s4] sm:$0xff]  ;;  %v168_v63 = vld [vmem:[%s755_s3 + $0x18] sm:$0xff] }
   0xc   :  { %38 = vadd.xlane.f32.xlu1 %v37_v16 }
   0xd   :  { %35 = vadd.xlane.f32.xlu0 %v34_v17 }
  0x10   :  { %68 = vadd.xlane.f32.xlu1 %v67_v22 }
  0x11   :  { %65 = vadd.xlane.f32.xlu0 %v64_v23 }
  0x21   :  { %175 = vperm.xlu1 %491, %v169_v52  }
  0x25   :  { %180 = vperm.xlu1 %491, %v170_v53  }
  0x27   :  { %87 = vperm.xlu0 %490, %v84_v27  }
  0x29   :  { %185 = vperm.xlu1 %491, %v171_v54  }
  0x2b   :  { %494 = vset.pattern.permute.xlu0 %v516_v3 }
  0x2d   :  { %190 = vperm.xlu1 %491, %v172_v55  }
  0x91   :  { %v60_v28 = vpop.xlane.xlu1 %59 }
  0x92   :  { %v70_v29 = vmul.f32 0.00390625, %v60_v28  ;;  %v30_v30 = vpop.xlane.xlu0 %29 }
  0x93   :  { %v40_v31 = vmul.f32 0.00390625, %v30_v30 }
  0x95   :  { %45 = vst.msk [vmem:[#allocation2] sm:$0xff] %vm44_vm1, %v40_v31  ;;  %v63_v32 = vpop.xlane.xlu1 %62 }
  0x96   :  { %75 = vst.msk [vmem:[#allocation2] sm:$0xff] %vm74_vm2, %v70_v29  ;;  %v71_v33 = vmul.f32 0.00390625, %v63_v32  ;;  %v33_v34 = vpop.xlane.xlu0 %32 }
  0x97   :  { %v41_v35 = vmul.f32 0.00390625, %v33_v34 }
  0x99   :  { %46 = vst.msk [vmem:[#allocation2 + $0x8] sm:$0xff] %vm44_vm1, %v41_v35  ;;  %v39_v36 = vpop.xlane.xlu1 %38 }
  0x9a   :  { %76 = vst.msk [vmem:[#allocation2 + $0x8] sm:$0xff] %vm74_vm2, %v71_v33  ;;  %v43_v37 = vmul.f32 0.00390625, %v39_v36  ;;  %v36_v38 = vpop.xlane.xlu0 %35 }
  0x9b   :  { %v42_v39 = vmul.f32 0.00390625, %v36_v38 }
  0x9c   :  { %48 = vst.msk [vmem:[#allocation2 + $0x18] sm:$0xff] %vm44_vm1, %v43_v37 }
  0x9d   :  { %47 = vst.msk [vmem:[#allocation2 + $0x10] sm:$0xff] %vm44_vm1, %v42_v39  ;;  %v69_v40 = vpop.xlane.xlu1 %68  ;;  %v79_v44 = vld [vmem:[#allocation2] sm:$0xff] }
  0x9e   :  { %v73_v41 = vmul.f32 0.00390625, %v69_v40  ;;  %v66_v42 = vpop.xlane.xlu0 %65 }
  0x9f   :  { %v72_v43 = vmul.f32 0.00390625, %v66_v42 }
  0xa0   :  { %78 = vst.msk [vmem:[#allocation2 + $0x18] sm:$0xff] %vm74_vm2, %v73_v41 }
  0xa1   :  { %77 = vst.msk [vmem:[#allocation2 + $0x10] sm:$0xff] %vm74_vm2, %v72_v43  ;;  %v80_v45 = vld [vmem:[#allocation2 + $0x8] sm:$0xff]  ;;  %v176_v7 = vpop.permute.xlu1 %175 }
  0xa2   :  { %v480_v46 = vpack.c.bf16 %v80_v45, %v79_v44 }
  0xa4   :  { %481 = vmatpush3.bf16.msra.mxu0 %v480_v46 }
  0xa5   :  { %482 = vmatprep.subr.bf16.mxu0 %v512_v24  ;;  %v181_v10 = vpop.permute.xlu1 %180 }
  0xa6   :  { %v88_v56 = vpop.permute.xlu0 %87 }
  0xa7   :  { %v82_v47 = vld [vmem:[#allocation2 + $0x18] sm:$0xff] }
  0xa8   :  { %v81_v48 = vld [vmem:[#allocation2 + $0x10] sm:$0xff] }
  0xa9   :  { %v483_v49 = vpack.c.bf16 %v82_v47, %v81_v48  ;;  %v186_v11 = vpop.permute.xlu1 %185 }
  0xab   :  { %484 = vmatpush3.bf16.msra.mxu0 %v483_v49 }
  0xad   :  { %v191_v25 = vpop.permute.xlu1 %190 }
  0xae   :  { %469 = vmatmul.mubr.msk.f32.vlgmr.msra.gmra.mrb[0].mxu0 %vm90_vm3, %v83_v50 }
 0x181   :  { %v160_v57 = vpop.f32.mrb[0].mxu0 }
 0x182   :  { %v161_v58 = vadd.f32 %v160_v57, %v88_v56  ;;  %v470_v59 = vpop.f32.mrb[1].mxu0 }
 0x184   :  { %v164_v60 = vmax.f32 %v161_v58, 0.0 }
 0x186   :  { %471 = vmatprep.subr.mxu1 %v164_v60 }
 0x187   :  { %472 = vmatpush3.msra.mxu1 %v164_v60 }
 0x188   :  { %474 = vmatmul.mubr.msk.f32.vlgmr.msra.gmra.mrb[0].mxu1 %vm193_vm4, %v166_v61 }
 0x189   :  { %476 = vmatprep.mubr.msk.f32.mxu1 %vm193_vm4, %v167_v62 }
 0x18c   :  { %477 = vmatmul.mubr.msk.f32.gmra.mrb[2].mxu1 %vm193_vm4, %v168_v63 }
 0x25b   :  { %v475_v16 = vpop.f32.mrb[0].mxu1 }
 0x25c   :  { %v278_v17 = vadd.f32 %v475_v16, %v181_v10  ;;  %v272_v22 = vpop.f32.mrb[1].mxu1 }
 0x25d   :  { %v273_v23 = vadd.f32 %v272_v22, %v176_v7 }
 0x25e   :  { %v292_v24 = vsub.f32 0.0, %v278_v17 }
 0x25f   :  { %v291_v27 = vsub.f32 0.0, %v273_v23  ;;  %v478_v28 = vpop.f32.mrb[2].mxu1 }
 0x260   :  { %v297_v29 = vmul.f32 1.442695, %v292_v24  ;;  %v288_v30 = vadd.f32 %v478_v28, %v191_v25  ;;  %v282_v31 = vpop.f32.mrb[3].mxu1 }
 0x261   :  { %v295_v32 = vmul.f32 1.442695, %v291_v27  ;;  %v283_v33 = vadd.f32 %v282_v31, %v186_v11 }
 0x262   :  { %496 = vpow2.f32 %v297_v29  ;;  %v294_v34 = vsub.f32 0.0, %v288_v30 }
 0x263   :  { %498 = vpow2.f32 %v295_v32  ;;  %v293_v35 = vsub.f32 0.0, %v283_v33 }
 0x264   :  { %v301_v36 = vmul.f32 1.442695, %v294_v34 }
 0x265   :  { %v299_v37 = vmul.f32 1.442695, %v293_v35 }
 0x266   :  { %500 = vpow2.f32 %v301_v36 }
 0x267   :  { %502 = vpow2.f32 %v299_v37 }
 0x26c   :  { %v497_v38 = vpop.eup %496 }
 0x26d   :  { %v499_v39 = vpop.eup %498  ;;  %v304_v40 = vadd.f32 1.0, %v497_v38 }
 0x26e   :  { %v303_v41 = vadd.f32 1.0, %v499_v39 }
 0x26f   :  { %504 = vrcp.f32 %v304_v40 }
 0x270   :  { %v501_v42 = vpop.eup %500  ;;  %506 = vrcp.f32 %v303_v41 }
 0x271   :  { %v503_v43 = vpop.eup %502  ;;  %v306_v44 = vadd.f32 1.0, %v501_v42 }
 0x272   :  { %v305_v45 = vadd.f32 1.0, %v503_v43 }
 0x273   :  { %508 = vrcp.f32 %v306_v44 }
 0x274   :  { %510 = vrcp.f32 %v305_v45 }
 0x279   :  { %v505_v46 = vpop.eup %504 }
 0x27a   :  { %v507_v47 = vpop.eup %506  ;;  %317 = vst.msk [vmem:[#allocation3 + $0x8] sm:$0xff] %vm315_vm5, %v505_v46 }
 0x27b   :  { %316 = vst.msk [vmem:[#allocation3] sm:$0xff] %vm315_vm5, %v507_v47 }
 0x27d   :  { %v509_v48 = vpop.eup %508 }
 0x27e   :  { %v511_v49 = vpop.eup %510  ;;  %319 = vst.msk [vmem:[#allocation3 + $0x18] sm:$0xff] %vm315_vm5, %v509_v48 }
 0x27f   :  { %318 = vst.msk [vmem:[#allocation3 + $0x10] sm:$0xff] %vm315_vm5, %v511_v49 }
 0x281   :  { %v321_v50 = vld [vmem:[#allocation3 + $0x8] sm:$0xff] }
 0x282   :  { %339 = vperm.xlu1 %491, %v321_v50   ;;  %v368_v51 = vld [vmem:[#allocation3] sm:$0xff] }
 0x283   :  { %382 = vperm.xlu0 %494, %v368_v51  }
 0x285   :  { %v371_v52 = vld [vmem:[#allocation3 + $0x18] sm:$0xff] }
 0x286   :  { %492 = vset.pattern.permute.xlu1 %v516_v3  ;;  %v322_v53 = vld [vmem:[#allocation3 + $0x10] sm:$0xff] }
 0x287   :  { %387 = vperm.xlu1 %492, %v321_v50   ;;  %397 = vperm.xlu0 %494, %v371_v52  }
 0x28b   :  { %493 = vset.pattern.permute.xlu1 %v515_v26 }
 0x28c   :  { %334 = vperm.xlu1 %493, %v368_v51  }
 0x290   :  { %349 = vperm.xlu1 %493, %v371_v52  }
 0x294   :  { %344 = vperm.xlu1 %493, %v322_v53  }
 0x298   :  { %495 = vset.pattern.permute.xlu1 %v516_v3 }
 0x299   :  { %392 = vperm.xlu1 %495, %v322_v53  }
 0x301   :  { %v340_v54 = vpop.permute.xlu1 %339 }
 0x302   :  { %v354_v55 = vmul.f32 %v340_v54, %v584_v8  ;;  %v355_v56 = vmul.f32 %v340_v54, %v589_v9  ;;  %v383_v57 = vpop.permute.xlu0 %382 }
 0x303   :  { %v400_v58 = vmul.f32 %v550_v0, %v383_v57  ;;  %v401_v59 = vmul.f32 %v555_v1, %v383_v57 }
 0x304   :  { %362 = vst [vmem:[%s757_s5 + $0x10] sm:$0xff] %v354_v55  ;;  %363 = vst [vmem:[%s757_s5 + $0x18] sm:$0xff] %v355_v56 }
 0x305   :  { %442 = vst [vmem:[%s757_s5 + $0x40] sm:$0xff] %v400_v58  ;;  %443 = vst [vmem:[%s757_s5 + $0x48] sm:$0xff] %v401_v59 }
 0x306   :  { %v388_v8 = vpop.permute.xlu1 %387  ;;  %v398_v0 = vpop.permute.xlu0 %397 }
 0x307   :  { %v402_v1 = vmul.f32 %v572_v5, %v388_v8  ;;  %v403_v9 = vmul.f32 %v577_v6, %v388_v8  ;;  %v406_v26 = vmul.f32 %v622_v18, %v398_v0  ;;  %v407_v60 = vmul.f32 %v627_v19, %v398_v0 }
 0x309   :  { %444 = vst [vmem:[%s757_s5 + $0x50] sm:$0xff] %v402_v1  ;;  %445 = vst [vmem:[%s757_s5 + $0x58] sm:$0xff] %v403_v9 }
 0x30a   :  { %448 = vst [vmem:[%s757_s5 + $0x70] sm:$0xff] %v406_v26  ;;  %449 = vst [vmem:[%s757_s5 + $0x78] sm:$0xff] %v407_v60 }
 0x30b   :  { %v335_v5 = vpop.permute.xlu1 %334 }
 0x30c   :  { %v352_v6 = vmul.f32 %v335_v5, %v560_v2  ;;  %v353_v18 = vmul.f32 %v335_v5, %v567_v4 }
 0x30e   :  { %360 = vst [vmem:[%s757_s5] sm:$0xff] %v352_v6  ;;  %361 = vst [vmem:[%s757_s5 + $0x8] sm:$0xff] %v353_v18 }
 0x30f   :  { %v350_v19 = vpop.permute.xlu1 %349 }
 0x310   :  { %v358_v61 = vmul.f32 %v350_v19, %v598_v12  ;;  %v359_v62 = vmul.f32 %v350_v19, %v603_v13 }
 0x312   :  { %366 = vst [vmem:[%s757_s5 + $0x30] sm:$0xff] %v358_v61  ;;  %367 = vst [vmem:[%s757_s5 + $0x38] sm:$0xff] %v359_v62 }
 0x313   :  { %v345_v2 = vpop.permute.xlu1 %344 }
 0x314   :  { %v356_v4 = vmul.f32 %v345_v2, %v608_v14  ;;  %v357_v63 = vmul.f32 %v345_v2, %v613_v15 }
 0x316   :  { %364 = vst [vmem:[%s757_s5 + $0x20] sm:$0xff] %v356_v4  ;;  %365 = vst [vmem:[%s757_s5 + $0x28] sm:$0xff] %v357_v63 }
 0x318   :  { %v393_v12 = vpop.permute.xlu1 %392 }
 0x319   :  { %v404_v13 = vmul.f32 %v632_v20, %v393_v12  ;;  %v405_v3 = vmul.f32 %v637_v21, %v393_v12 }
 0x31b   :  { %446 = vst [vmem:[%s757_s5 + $0x60] sm:$0xff] %v404_v13  ;;  %447 = vst [vmem:[%s757_s5 + $0x68] sm:$0xff] %v405_v3 }

</bundles_post_ra>
